<compile_context>
chip_gen: v5e
topology: v5e:2x2
jax: 0.10.0
libtpu: 0.0.40
codegen_flags: <defaults>
</compile_context>

<pallas_src>
import jax
import jax.numpy as jnp
from jax.experimental import pallas as pl
from jax.experimental.pallas import tpu as pltpu

_EPS = 1e-8                    # torch.nn.CosineSimilarity default eps
_OUT_SUB, _OUT_LANE = 8, 128   # one aligned (8,128) f32 tile per batch-tile partial
_F32_BLOCK_BYTES = 4 * 1024 * 1024   # per-input block cap, budgeted in f32 bytes
_MAX_LANES = 8192                    # max feature-tile width (lanes)


def _choose_tiles(B, D, itemsize):
    """Pick (TB, TD) satisfying TPU block constraints, budgeted against the f32
    working set (bf16 expands 2x when upcast in-kernel) so v7x's 64 MiB VMEM is
    safe, while preferring a TD that divides D (no ragged-lane masking) and
    forcing >= 2 batch tiles for v7x megacore sharding."""
    # Feature tile: whole D when modest; else largest multiple-of-128 divisor
    # of D (no masking), falling back to 2048-lane chunks + last-tile mask.
    if D <= _MAX_LANES:
        TD = D
    else:
        TD = 2048
        for cand in range(_MAX_LANES, 127, -128):
            if D % cand == 0:
                TD = cand
                break

    sub = 16 if itemsize < 4 else 8   # bf16 packs 16 sublanes per vreg
    max_rows = max(1, _F32_BLOCK_BYTES // (TD * 4))   # budget in f32 bytes
    TB = min(B, max_rows)
    # v7x megacore: guarantee >= 2 tiles on the "parallel" batch axis so the
    # grid shards across both TensorCores (harmless on single-TC v5e/v6e).
    if TB >= B and B > sub:
        TB = (B + 1) // 2
    if TB < B:
        TB = max(sub, -(-TB // sub) * sub)   # round UP to a sublane multiple
        if TB >= B:
            TB = B
    return TB, TD


def _make_kernel(B, D, TB, TD, lanew):
    groups = TD // 128 if lanew == 128 else 1

    def lane_partials(x):
        # (TB, TD) -> (TB, lanew) partial sums using only lane-aligned static
        # slices + VPU adds (no per-step cross-lane XLU reduce when lanew==128).
        if lanew == 1:
            return jnp.sum(x, axis=1, keepdims=True)
        acc = x[:, 0:128]
        for g in range(1, groups):
            acc = acc + x[:, g * 128:(g + 1) * 128]
        return acc

    def kernel(s_ref, t_ref, o_ref, dot_acc, ns_acc, nt_acc):
        i = pl.program_id(0)   # batch tile (parallel)
        k = pl.program_id(1)   # feature tile (reduction, innermost)

        @pl.when(k == 0)
        def _init():
            dot_acc[...] = jnp.zeros_like(dot_acc)
            ns_acc[...] = jnp.zeros_like(ns_acc)
            nt_acc[...] = jnp.zeros_like(nt_acc)

        s = s_ref[...].astype(jnp.float32)   # (TB, TD)
        t = t_ref[...].astype(jnp.float32)   # (TB, TD)

        def accumulate(sv, tv):
            dot_acc[...] += lane_partials(sv * tv)
            ns_acc[...] += lane_partials(sv * sv)
            nt_acc[...] += lane_partials(tv * tv)

        if D % TD != 0:
            # Only the last feature tile pays for the ragged-lane masking.
            @pl.when(k < pl.num_programs(1) - 1)
            def _hot():
                accumulate(s, t)

            @pl.when(k == pl.num_programs(1) - 1)
            def _last():
                col = jax.lax.broadcasted_iota(jnp.int32, (TB, TD), 1) + k * TD
                valid = col < D
                accumulate(jnp.where(valid, s, 0.0), jnp.where(valid, t, 0.0))
        else:
            accumulate(s, t)

        @pl.when(k == pl.num_programs(1) - 1)
        def _finalize():
            # Single cross-lane reduce per accumulator, only at finalize.
            dot = jnp.sum(dot_acc[...], axis=1, keepdims=True)   # (TB, 1)
            ns = jnp.sum(ns_acc[...], axis=1, keepdims=True)
            nt = jnp.sum(nt_acc[...], axis=1, keepdims=True)
            # dot / max(||s|| * ||t||, eps); sqrt(ns)*sqrt(nt) avoids f32
            # overflow of the squared-norm product.
            denom = jnp.sqrt(ns) * jnp.sqrt(nt)
            cos = dot / jnp.maximum(denom, _EPS)
            one_minus = 1.0 - cos
            if B % TB != 0:
                row = jax.lax.broadcasted_iota(jnp.int32, (TB, 1), 0) + i * TB
                one_minus = jnp.where(row < B, one_minus, 0.0)
            tile_sum = jnp.sum(one_minus)   # scalar partial for this batch tile
            # Lane-dense, fully aligned (1, 8, 128) output block per batch tile.
            o_ref[...] = jnp.full(o_ref.shape, tile_sum, jnp.float32)

    return kernel


def cosine_distill(student, teacher, beta=100.0, *, tile_rows=None, tile_cols=None):
    """Pallas implementation of CosineDistill.forward for 2-D (B, D) inputs."""
    assert student.shape == teacher.shape and student.ndim == 2, (
        "cosine_distill expects 2-D (batch, features) inputs")
    # TODO(synk): N-D inputs (trailing dims after the dim=1 feature axis) are not supported.
    B, D = student.shape
    itemsize = jnp.dtype(student.dtype).itemsize
    sub = 16 if itemsize < 4 else 8
    TB, TD = _choose_tiles(B, D, itemsize)
    if tile_rows is not None:   # test hook
        assert tile_rows == B or tile_rows % sub == 0, (
            f"tile_rows must equal B or be a multiple of {sub}")
        TB = tile_rows
    if tile_cols is not None:   # test hook
        assert tile_cols == D or tile_cols % 128 == 0, (
            "tile_cols must equal D or be a multiple of 128")
        TD = tile_cols
    nb = pl.cdiv(B, TB)
    nd = pl.cdiv(D, TD)
    lanew = 128 if (nd > 1 and TD % 128 == 0) else 1
    beta_f = float(beta)

    # VMEM budget: double-buffered HBM blocks + f32 upcast temps + scratch.
    est = (2 * 2 * TB * TD * itemsize        # 2 inputs x 2 pipeline buffers
           + 2 * TB * TD * 4                 # f32 upcast temporaries
           + 3 * TB * lanew * 4              # accumulators
           + 2 * _OUT_SUB * _OUT_LANE * 4)   # output block buffers
    # Cap at 48 MiB so we stay within v7x's 64 MiB physical VMEM.
    vmem_limit = min(48 * 1024 * 1024, max(32 * 1024 * 1024, int(est * 1.25)))

    kernel = _make_kernel(B, D, TB, TD, lanew)
    out = pl.pallas_call(
        kernel,
        out_shape=jax.ShapeDtypeStruct((nb, _OUT_SUB, _OUT_LANE), jnp.float32),
        grid_spec=pltpu.PrefetchScalarGridSpec(
            num_scalar_prefetch=0,
            grid=(nb, nd),
            in_specs=[
                pl.BlockSpec((TB, TD), lambda i, k: (i, k)),
                pl.BlockSpec((TB, TD), lambda i, k: (i, k)),
            ],
            out_specs=pl.BlockSpec((1, _OUT_SUB, _OUT_LANE), lambda i, k: (i, 0, 0)),
            scratch_shapes=[
                pltpu.VMEM((TB, lanew), jnp.float32),  # lane-group sum s*t
                pltpu.VMEM((TB, lanew), jnp.float32),  # lane-group sum s*s
                pltpu.VMEM((TB, lanew), jnp.float32),  # lane-group sum t*t
            ],
        ),
        compiler_params=pltpu.CompilerParams(
            dimension_semantics=("parallel", "arbitrary"),
            vmem_limit_bytes=vmem_limit,
        ),
    )(student, teacher)

    # Tiny O(num_tiles) epilogue: sum per-batch-tile partials, normalize by true B.
    partials = out[:, 0, 0]                    # (nb,)
    return (beta_f / B) * jnp.sum(partials)


def cosine_distill_ref(student, teacher, beta=100.0):
    """Pure-JAX reference mirroring the PyTorch module."""
    s = student.astype(jnp.float32)
    t = teacher.astype(jnp.float32)
    dot = jnp.sum(s * t, axis=1)
    denom = jnp.maximum(jnp.linalg.norm(s, axis=1) * jnp.linalg.norm(t, axis=1), _EPS)
    cos = dot / denom
    return beta * jnp.mean(1.0 - cos, axis=0)


if __name__ == "__main__":
    key = jax.random.PRNGKey(0)

    # Test 1: small f32 case, single tile (nb=1, nd=1).
    k1, k2 = jax.random.split(key)
    s1 = jax.random.normal(k1, (8, 128), dtype=jnp.float32)
    t1 = jax.random.normal(k2, (8, 128), dtype=jnp.float32)
    out1 = jax.block_until_ready(cosine_distill(s1, t1, beta=100.0))
    ref1 = cosine_distill_ref(s1, t1, beta=100.0)
    assert jnp.allclose(out1, ref1, rtol=1e-5, atol=1e-5), (out1, ref1)

    # Test 2: batch tiling + row masking (20 % 8 != 0), feature tiling with a
    # ragged last tile (160 % 128 != 0) -> exercises the last-tile-only mask.
    k3, k4 = jax.random.split(k1)
    s2 = jax.random.normal(k3, (20, 160), dtype=jnp.float32)
    t2 = jax.random.normal(k4, (20, 160), dtype=jnp.float32)
    out2 = jax.block_until_ready(
        cosine_distill(s2, t2, beta=100.0, tile_rows=8, tile_cols=128))
    ref2 = cosine_distill_ref(s2, t2, beta=100.0)
    assert jnp.allclose(out2, ref2, rtol=1e-5, atol=1e-5), (out2, ref2)

    # Test 3: bf16 HBM stream, f32 in-kernel accumulation; default tile pick
    # forces the v7x megacore batch split (nb=2) since B fits one tile.
    k5, k6 = jax.random.split(k2)
    s3 = jax.random.normal(k5, (32, 256), dtype=jnp.float32).astype(jnp.bfloat16)
    t3 = jax.random.normal(k6, (32, 256), dtype=jnp.float32).astype(jnp.bfloat16)
    out3 = jax.block_until_ready(cosine_distill(s3, t3, beta=100.0))
    ref3 = cosine_distill_ref(s3, t3, beta=100.0)
    assert jnp.allclose(out3, ref3, rtol=1e-4, atol=1e-4), (out3, ref3)

    # Test 4: multi feature tile without masking (512 % 256 == 0) ->
    # lane-group (TB,128) accumulation path + batch split, no mask branches.
    k7, k8 = jax.random.split(k3)
    s4 = jax.random.normal(k7, (32, 512), dtype=jnp.float32)
    t4 = jax.random.normal(k8, (32, 512), dtype=jnp.float32)
    out4 = jax.block_until_ready(cosine_distill(s4, t4, beta=100.0, tile_cols=256))
    ref4 = cosine_distill_ref(s4, t4, beta=100.0)
    assert jnp.allclose(out4, ref4, rtol=1e-5, atol=1e-5), (out4, ref4)

    print("KERNEL_OK")
</pallas_src>

<mosaic_0001>
module attributes {stable_mosaic.version = 11 : i64} {
  func.func @kernel(%arg0: i32, %arg1: i32, %arg2: memref<8x128xf32, #tpu.memory_space<vmem>>, %arg3: memref<8x128xf32, #tpu.memory_space<vmem>>, %arg4: memref<1x8x128xf32, #tpu.memory_space<vmem>>, %arg5: memref<8x1xf32, #tpu.memory_space<vmem>>, %arg6: memref<8x1xf32, #tpu.memory_space<vmem>>, %arg7: memref<8x1xf32, #tpu.memory_space<vmem>>) attributes {dimension_semantics = [#tpu.dimension_semantics<parallel>, #tpu.dimension_semantics<arbitrary>], iteration_bounds = array<i64: 1, 1>, scalar_prefetch = 0 : i64, scratch_operands = 3 : i64, tpu.core_type = #tpu.core_type<tc>, window_params = [{transform_indices = @transform_0, window_bounds = array<i64: 8, 128>}, {transform_indices = @transform_1, window_bounds = array<i64: 8, 128>}, {transform_indices = @transform_2, window_bounds = array<i64: 1, 8, 128>}]} {
    %c0_i32 = arith.constant 0 : i32
    %0 = arith.cmpi eq, %arg1, %c0_i32 : i32
    %1 = arith.extui %0 : i1 to i32
    %c0_i32_0 = arith.constant 0 : i32
    %2 = arith.cmpi ne, %1, %c0_i32_0 : i32
    scf.if %2 {
      %cst_20 = arith.constant 0.000000e+00 : f32
      %26 = vector.broadcast %cst_20 : f32 to vector<8x1xf32>
      %c0_21 = arith.constant 0 : index
      %c0_22 = arith.constant 0 : index
      %27 = vector.load %arg5[%c0_21, %c0_22] : memref<8x1xf32, #tpu.memory_space<vmem>>, vector<8x1xf32>
      tpu.vector_store %arg5[%c0_21, %c0_22], %26 {strides = array<i32>} : memref<8x1xf32, #tpu.memory_space<vmem>>, vector<8x1xf32>,
      %cst_23 = arith.constant 0.000000e+00 : f32
      %28 = vector.broadcast %cst_23 : f32 to vector<8x1xf32>
      %c0_24 = arith.constant 0 : index
      %c0_25 = arith.constant 0 : index
      %29 = vector.load %arg6[%c0_24, %c0_25] : memref<8x1xf32, #tpu.memory_space<vmem>>, vector<8x1xf32>
      tpu.vector_store %arg6[%c0_24, %c0_25], %28 {strides = array<i32>} : memref<8x1xf32, #tpu.memory_space<vmem>>, vector<8x1xf32>,
      %cst_26 = arith.constant 0.000000e+00 : f32
      %30 = vector.broadcast %cst_26 : f32 to vector<8x1xf32>
      %c0_27 = arith.constant 0 : index
      %c0_28 = arith.constant 0 : index
      %31 = vector.load %arg7[%c0_27, %c0_28] : memref<8x1xf32, #tpu.memory_space<vmem>>, vector<8x1xf32>
      tpu.vector_store %arg7[%c0_27, %c0_28], %30 {strides = array<i32>} : memref<8x1xf32, #tpu.memory_space<vmem>>, vector<8x1xf32>,
    } else {
    }
    %c0 = arith.constant 0 : index
    %c0_1 = arith.constant 0 : index
    %3 = vector.load %arg2[%c0, %c0_1] : memref<8x128xf32, #tpu.memory_space<vmem>>, vector<8x128xf32>
    %c0_2 = arith.constant 0 : index
    %c0_3 = arith.constant 0 : index
    %4 = vector.load %arg3[%c0_2, %c0_3] : memref<8x128xf32, #tpu.memory_space<vmem>>, vector<8x128xf32>
    %c0_4 = arith.constant 0 : index
    %c0_5 = arith.constant 0 : index
    %5 = vector.load %arg5[%c0_4, %c0_5] : memref<8x1xf32, #tpu.memory_space<vmem>>, vector<8x1xf32>
    %6 = arith.mulf %3, %4 : vector<8x128xf32>
    %cst = arith.constant dense<0.000000e+00> : vector<8xf32>
    %7 = vector.multi_reduction <add>, %6, %cst [1] : vector<8x128xf32> to vector<8xf32>
    %8 = vector.shape_cast %7 : vector<8xf32> to vector<8x1xf32>
    %9 = arith.addf %5, %8 : vector<8x1xf32>
    %c0_6 = arith.constant 0 : index
    %c0_7 = arith.constant 0 : index
    %10 = vector.load %arg5[%c0_6, %c0_7] : memref<8x1xf32, #tpu.memory_space<vmem>>, vector<8x1xf32>
    tpu.vector_store %arg5[%c0_6, %c0_7], %9 {strides = array<i32>} : memref<8x1xf32, #tpu.memory_space<vmem>>, vector<8x1xf32>,
    %c0_8 = arith.constant 0 : index
    %c0_9 = arith.constant 0 : index
    %11 = vector.load %arg6[%c0_8, %c0_9] : memref<8x1xf32, #tpu.memory_space<vmem>>, vector<8x1xf32>
    %12 = arith.mulf %3, %3 : vector<8x128xf32>
    %cst_10 = arith.constant dense<0.000000e+00> : vector<8xf32>
    %13 = vector.multi_reduction <add>, %12, %cst_10 [1] : vector<8x128xf32> to vector<8xf32>
    %14 = vector.shape_cast %13 : vector<8xf32> to vector<8x1xf32>
    %15 = arith.addf %11, %14 : vector<8x1xf32>
    %c0_11 = arith.constant 0 : index
    %c0_12 = arith.constant 0 : index
    %16 = vector.load %arg6[%c0_11, %c0_12] : memref<8x1xf32, #tpu.memory_space<vmem>>, vector<8x1xf32>
    tpu.vector_store %arg6[%c0_11, %c0_12], %15 {strides = array<i32>} : memref<8x1xf32, #tpu.memory_space<vmem>>, vector<8x1xf32>,
    %c0_13 = arith.constant 0 : index
    %c0_14 = arith.constant 0 : index
    %17 = vector.load %arg7[%c0_13, %c0_14] : memref<8x1xf32, #tpu.memory_space<vmem>>, vector<8x1xf32>
    %18 = arith.mulf %4, %4 : vector<8x128xf32>
    %cst_15 = arith.constant dense<0.000000e+00> : vector<8xf32>
    %19 = vector.multi_reduction <add>, %18, %cst_15 [1] : vector<8x128xf32> to vector<8xf32>
    %20 = vector.shape_cast %19 : vector<8xf32> to vector<8x1xf32>
    %21 = arith.addf %17, %20 : vector<8x1xf32>
    %c0_16 = arith.constant 0 : index
    %c0_17 = arith.constant 0 : index
    %22 = vector.load %arg7[%c0_16, %c0_17] : memref<8x1xf32, #tpu.memory_space<vmem>>, vector<8x1xf32>
    tpu.vector_store %arg7[%c0_16, %c0_17], %21 {strides = array<i32>} : memref<8x1xf32, #tpu.memory_space<vmem>>, vector<8x1xf32>,
    %c0_i32_18 = arith.constant 0 : i32
    %23 = arith.cmpi eq, %arg1, %c0_i32_18 : i32
    %24 = arith.extui %23 : i1 to i32
    %c0_i32_19 = arith.constant 0 : i32
    %25 = arith.cmpi ne, %24, %c0_i32_19 : i32
    scf.if %25 {
      %c0_20 = arith.constant 0 : index
      %c0_21 = arith.constant 0 : index
      %26 = vector.load %arg5[%c0_20, %c0_21] : memref<8x1xf32, #tpu.memory_space<vmem>>, vector<8x1xf32>
      %cst_22 = arith.constant dense<0.000000e+00> : vector<8xf32>
      %27 = vector.multi_reduction <add>, %26, %cst_22 [1] : vector<8x1xf32> to vector<8xf32>
      %28 = vector.shape_cast %27 : vector<8xf32> to vector<8x1xf32>
      %c0_23 = arith.constant 0 : index
      %c0_24 = arith.constant 0 : index
      %29 = vector.load %arg6[%c0_23, %c0_24] : memref<8x1xf32, #tpu.memory_space<vmem>>, vector<8x1xf32>
      %cst_25 = arith.constant dense<0.000000e+00> : vector<8xf32>
      %30 = vector.multi_reduction <add>, %29, %cst_25 [1] : vector<8x1xf32> to vector<8xf32>
      %31 = vector.shape_cast %30 : vector<8xf32> to vector<8x1xf32>
      %c0_26 = arith.constant 0 : index
      %c0_27 = arith.constant 0 : index
      %32 = vector.load %arg7[%c0_26, %c0_27] : memref<8x1xf32, #tpu.memory_space<vmem>>, vector<8x1xf32>
      %cst_28 = arith.constant dense<0.000000e+00> : vector<8xf32>
      %33 = vector.multi_reduction <add>, %32, %cst_28 [1] : vector<8x1xf32> to vector<8xf32>
      %34 = vector.shape_cast %33 : vector<8xf32> to vector<8x1xf32>
      %35 = math.sqrt %31 : vector<8x1xf32>
      %36 = math.sqrt %34 : vector<8x1xf32>
      %37 = arith.mulf %35, %36 : vector<8x1xf32>
      %cst_29 = arith.constant 9.99999993E-9 : f32
      %38 = vector.broadcast %cst_29 : f32 to vector<8x1xf32>
      %39 = arith.maximumf %37, %38 : vector<8x1xf32>
      %40 = arith.divf %28, %39 : vector<8x1xf32>
      %cst_30 = arith.constant 1.000000e+00 : f32
      %41 = vector.broadcast %cst_30 : f32 to vector<8x1xf32>
      %42 = arith.subf %41, %40 : vector<8x1xf32>
      %43 = vector.shape_cast %42 : vector<8x1xf32> to vector<1x8x1xf32>
      %cst_31 = arith.constant dense<0.000000e+00> : vector<1xf32>
      %44 = vector.multi_reduction <add>, %43, %cst_31 [1, 2] : vector<1x8x1xf32> to vector<1xf32>
      %45 = vector.shape_cast %44 : vector<1xf32> to vector<1x1x1xf32>
      %46 = vector.extract %45[0, 0, 0] : f32 from vector<1x1x1xf32>
      %47 = vector.broadcast %46 : f32 to vector<1x8x128xf32>
      %c0_32 = arith.constant 0 : index
      %c0_33 = arith.constant 0 : index
      %c0_34 = arith.constant 0 : index
      %48 = vector.load %arg4[%c0_32, %c0_33, %c0_34] : memref<1x8x128xf32, #tpu.memory_space<vmem>>, vector<1x8x128xf32>
      tpu.vector_store %arg4[%c0_32, %c0_33, %c0_34], %47 {strides = array<i32>} : memref<1x8x128xf32, #tpu.memory_space<vmem>>, vector<1x8x128xf32>,
    } else {
    }
    return
  }
  func.func @transform_0(%arg0: i32, %arg1: i32) -> (i32, i32) {
    %c0_i32 = arith.constant 0 : i32
    return %arg0, %arg1 : i32, i32
  }
  func.func @transform_1(%arg0: i32, %arg1: i32) -> (i32, i32) {
    %c0_i32 = arith.constant 0 : i32
    return %arg0, %arg1 : i32, i32
  }
  func.func @transform_2(%arg0: i32, %arg1: i32) -> (i32, i32, i32) {
    %c0_i32 = arith.constant 0 : i32
    %c0_i32_0 = arith.constant 0 : i32
    %c0_i32_1 = arith.constant 0 : i32
    return %arg0, %c0_i32, %c0_i32_0 : i32, i32, i32
  }
}

</mosaic_0001>

<bundles_post_ra>
// kernel: tpu_custom_call.1
= control target key start
LH: loop header
LB: loop body
LE: loop exit
PB: predicated region body
PF: predicated region fallthrough
CT: control target
= control target key end

     0   :  { %7 = vsyncpa [#allocation6], 0  ;;  %s275_s0 = inlined_call_operand.hbm [shape: f32[8,128], index: 0, kind: input, shape index: {}]   ;;  %s276_s1 = inlined_call_operand.hbm [shape: f32[8,128], index: 1, kind: input, shape index: {}]   ;;  %s277_s2 = inlined_call_operand.hbm [shape: f32[1,8,128], index: 2, kind: output, shape index: {}]  }
   0x1   :  { %8 = vsyncpa [#allocation9], 0 }
   0x2   :  { %9 = vsyncpa [#allocation7], 0  ;;  %s15_s11 = sshll.u32 %s275_s0, 4  ;;  %s240_s12 = smov [#allocation5]   ;;  %s16_s11 = int_to_ptr.hbm [resolvable:$true] %s15_s11 }
   0x3   :  { %s17_s13 = sshll.u32 %s240_s12, 4  ;;  %s26_s16 = sshll.u32 %s276_s1, 4  ;;  %s18_s13 = int_to_ptr.vmem [resolvable:$true] %s17_s13  ;;  %s27_s16 = int_to_ptr.hbm [resolvable:$true] %s26_s16 }
   0x4   :  { %20 = dma.hbm_to_vmem [thread:$0]  %s16_s11, 128, %s18_s13, [#allocation6]  }
   0x5   :  { %s241_s17 = smov [#allocation8]  }
   0x6   :  { %s28_s18 = sshll.u32 %s241_s17, 4  ;;  %s29_s18 = int_to_ptr.vmem [resolvable:$true] %s28_s18 }
   0x7   :  { %31 = dma.hbm_to_vmem [thread:$0]  %s27_s16, 128, %s29_s18, [#allocation9]  }
   0x8   :  { %234 = dma.done.wait [#allocation6], 128  }
   0x9   :  { %235 = vsyncadd [#allocation6], 4294967168 }
   0xa   :  { %236 = dma.done.wait [#allocation9], 128  }
   0xb   :  { %237 = vsyncadd [#allocation9], 4294967168  ;;  %vm44_vm0 = vcmask 7168   ;;  %v242_v0 = vmov 0.0   ;;  %v48_v1 = vld [vmem:[#allocation5] sm:$0xff]  ;;  %v49_v2 = vld [vmem:[#allocation8] sm:$0xff] }
   0xc   :  { %46 = vst.msk [vmem:[#allocation3] sm:$0xff] %vm44_vm0, %v242_v0  ;;  %v58_v3 = vmul.f32 %v48_v1, %v48_v1  ;;  %v51_v4 = vmul.f32 %v49_v2, %v48_v1  ;;  %v64_v5 = vmul.f32 %v49_v2, %v49_v2  ;;  %s243_s0 = smov [#allocation10]   ;;  %s139_s21 = sshll.u32 %s277_s2, 4  ;;  %s140_s21 = int_to_ptr.hbm [resolvable:$true] %s139_s21 }
   0xd   :  { %45 = vst.msk [vmem:[#allocation2] sm:$0xff] %vm44_vm0, %v242_v0  ;;  %s137_s1 = sshll.u32 %s243_s0, 4  ;;  %s138_s1 = int_to_ptr.vmem [resolvable:$true] %s137_s1 }
   0xe   :  { %47 = vst.msk [vmem:[#allocation4] sm:$0xff] %vm44_vm0, %v242_v0  ;;  %59 = vadd.xlane.f32.xlu0 %v58_v3  ;;  %52 = vadd.xlane.f32.xlu1 %v51_v4 }
  0x13   :  { %v57_v6 = vld [vmem:[#allocation3] sm:$0xff] }
  0x14   :  { %v50_v7 = vld [vmem:[#allocation2] sm:$0xff] }
  0x15   :  { %v63_v12 = vld [vmem:[#allocation4] sm:$0xff] }
  0x16   :  { %65 = vadd.xlane.f32.xlu0 %v64_v5 }
  0x81   :  { %v60_v8 = vpop.xlane.xlu0 %59  ;;  %v53_v9 = vpop.xlane.xlu1 %52 }
  0x82   :  { %v61_v10 = vadd.f32 %v60_v8, %v57_v6  ;;  %v54_v11 = vadd.f32 %v53_v9, %v50_v7 }
  0x84   :  { %62 = vst.msk [vmem:[#allocation3] sm:$0xff] %vm44_vm0, %v61_v10 }
  0x85   :  { %56 = vst.msk [vmem:[#allocation2] sm:$0xff] %vm44_vm0, %v54_v11 }
  0x89   :  { %v66_v13 = vpop.xlane.xlu0 %65 }
  0x8a   :  { %v67_v14 = vadd.f32 %v66_v13, %v63_v12 }
  0x8b   :  { %v74_v15 = vld [vmem:[#allocation3] sm:$0xff] }
  0x8c   :  { %68 = vst.msk [vmem:[#allocation4] sm:$0xff] %vm44_vm0, %v67_v14  ;;  %156 = vrsqrt.f32 %v74_v15  ;;  %vm85_vm1 = vcmp.eq.f32.partialorder %v74_v15, inf  ;;  %v88_v32 = vand.u32 2147483648, %v74_v15  ;;  %vm87_vm3 = vcmp.eq.f32.partialorder %v74_v15, 0.0  ;;  %v72_v46 = vld [vmem:[#allocation2] sm:$0xff] }
  0x92   :  { %v157_v16 = vpop.eup %156 }
  0x93   :  { %v76_v17 = vld [vmem:[#allocation4] sm:$0xff]  ;;  %v79_v18 = vmul.f32 %v157_v16, %v74_v15 }
  0x94   :  { %158 = vrsqrt.f32 %v76_v17  ;;  %vm97_vm2 = vcmp.eq.f32.partialorder %v76_v17, inf  ;;  %v100_v33 = vand.u32 2147483648, %v76_v17  ;;  %vm99_vm4 = vcmp.eq.f32.partialorder %v76_v17, 0.0 }
  0x95   :  { %v80_v19 = vmul.f32 %v157_v16, %v79_v18 }
  0x97   :  { %v81_v20 = vmul.f32 0.5, %v80_v19 }
  0x99   :  { %v82_v21 = vsub.f32 1.5, %v81_v20 }
  0x9a   :  { %v159_v22 = vpop.eup %158 }
  0x9b   :  { %v91_v23 = vmul.f32 %v159_v22, %v76_v17  ;;  %v83_v24 = vmul.f32 %v157_v16, %v82_v21 }
  0x9d   :  { %v92_v25 = vmul.f32 %v159_v22, %v91_v23  ;;  %v84_v27 = vmul.f32 %v83_v24, %v74_v15 }
  0x9f   :  { %v93_v26 = vmul.f32 0.5, %v92_v25  ;;  %v86_v30 = vsel %vm85_vm1, %v74_v15, %v84_v27 }
  0xa0   :  { %v89_v35 = vsel %vm87_vm3, %v88_v32, %v86_v30 }
  0xa1   :  { %v94_v28 = vsub.f32 1.5, %v93_v26 }
  0xa3   :  { %v95_v29 = vmul.f32 %v159_v22, %v94_v28 }
  0xa5   :  { %v96_v31 = vmul.f32 %v95_v29, %v76_v17 }
  0xa7   :  { %v98_v34 = vsel %vm97_vm2, %v76_v17, %v96_v31 }
  0xa8   :  { %v101_v36 = vsel %vm99_vm4, %v100_v33, %v98_v34 }
  0xa9   :  { %v102_v37 = vmul.f32 %v101_v36, %v89_v35 }
  0xab   :  { %v103_v38 = vmax.f32 %v102_v37, 1e-08 }
  0xad   :  { %160 = vrcp.f32 %v103_v38  ;;  %v115_v42 = vand.u32 2147483648, %v103_v38  ;;  %v113_v44 = vand.u32 2147483647, %v103_v38  ;;  %vm109_vm6 = vweird.f32 %v103_v38 }
  0xaf   :  { %v116_v47 = vor.u32 1.1754944e-38, %v115_v42  ;;  %vm114_vm8 = vcmp.eq.f32.partialorder %v113_v44, 8.507059e+37 }
  0xb3   :  { %v161_v39 = vpop.eup %160 }
  0xb4   :  { %v105_v40 = vmul.f32 %v161_v39, %v103_v38  ;;  %vm110_vm5 = vweird.f32 %v161_v39 }
  0xb5   :  { %vm111_vm7 = vmor %vm109_vm6, %vm110_vm5 }
  0xb6   :  { %v106_v41 = vsub.f32 1.0, %v105_v40 }
  0xb8   :  { %v107_v43 = vmul.f32 %v161_v39, %v106_v41 }
  0xba   :  { %v108_v45 = vadd.f32 %v161_v39, %v107_v43 }
  0xbc   :  { %v112_v48 = vsel %vm111_vm7, %v161_v39, %v108_v45 }
  0xbd   :  { %v117_v49 = vsel %vm114_vm8, %v116_v47, %v112_v48 }
  0xbe   :  { %v118_v50 = vmul.f32 %v117_v49, %v72_v46 }
  0xc0   :  { %v119_v51 = vsub.f32 1.0, %v118_v50 }
  0xc2   :  { %v120_v52 = vsel %vm44_vm0, %v119_v51, 0.0 }
  0xc3   :  { %121 = vadd.xlane.f32.xlu1 %v120_v52 }
 0x136   :  { %v122_v53 = vpop.xlane.xlu1 %121 }
 0x137   :  { %v123_v54 = vrot.slane %v122_v53, 4 }
 0x139   :  { %v124_v55 = vadd.f32 %v123_v54, %v122_v53 }
 0x13b   :  { %v125_v56 = vrot.slane %v124_v55, 2 }
 0x13d   :  { %v126_v57 = vadd.f32 %v125_v56, %v124_v55 }
 0x13f   :  { %v127_v58 = vrot.slane %v126_v57, 1 }
 0x141   :  { %v128_v59 = vadd.f32 %v127_v58, %v126_v57 }
 0x143   :  { %150 = vpush %v128_v59 }
 0x174   :  { %s151_s22 = spop %150 }
 0x175   :  { %v130_v60 = vstv %s151_s22 }
 0x176   :  { %131 = vst [vmem:[#allocation10] sm:$0xff] %v130_v60 }
 0x177   :  { %142 = dma.vmem_to_hbm [thread:$0]  %s138_s1, 128, %s140_s21, [#allocation7]  }
 0x178   :  { %238 = dma.done.wait [#allocation7], 128  }
 0x179   :  { %239 = vsyncadd [#allocation7], 4294967168 }
 0x17a   :  { %147 = vsyncpa [#allocation6], 1 }
 0x17b   :  { %148 = vsyncpa [#allocation9], 1 }
 0x17c   :  { %149 = vsyncpa [#allocation7], 1 }

</bundles_post_ra>
